<compile_context>
chip_gen: v6e
topology: v6e:2x2x1
jax: 0.10.0
libtpu: 0.0.40
codegen_flags: <defaults>
</compile_context>

<pallas_src>
import jax
import jax.numpy as jnp
from jax.experimental import pallas as pl
from jax.experimental.pallas import tpu as pltpu


def _relu_transpose_kernel(x_ref, o_ref):
    # x_ref: (1, Cb, tH, tW)  ->  o_ref: (1, Cb, tW, tH)
    v = jnp.maximum(x_ref[...], 0)
    # Sub-32-bit floats pack along sublanes; unpack to f32 vregs before the
    # XLU transpose so we don't pay the packed-lane shuffle penalty.
    if v.dtype.itemsize < 4 and jnp.issubdtype(v.dtype, jnp.floating):
        v = v.astype(jnp.float32)
    o_ref[...] = jnp.swapaxes(v, -1, -2).astype(o_ref.dtype)


def _vmem_capacity_bytes() -> int:
    try:
        info = pltpu.get_tpu_info()
        cap = getattr(info, "vmem_capacity_bytes", None)
        if cap:
            return int(cap)
    except Exception:
        pass
    return 64 * 1024 * 1024  # conservative: assume v7x-class (64 MiB / TC)


def _largest_divisor_leq(n: int, cap: int) -> int:
    cap = max(1, min(n, cap))
    for d in range(cap, 0, -1):
        if n % d == 0:
            return d
    return 1


def _pick_tile(dim: int, candidates) -> int:
    # dim is a multiple of 128 here, so 128 (last candidate) always divides.
    for t in candidates:
        if t <= dim and dim % t == 0:
            return t
    return 128


def relu_permute_0132(x: jax.Array) -> jax.Array:
    """Equivalent to relu(x).permute(0, 1, 3, 2) for x of shape (N, C, H, W).

    The softmax in the PyTorch module is dead code and is intentionally not
    computed.
    """
    N, C, H, W = x.shape
    itemsize = jnp.dtype(x.dtype).itemsize

    # --- generation-aware VMEM budget & tile candidates --------------------
    if _vmem_capacity_bytes() >= 128 * 1024 * 1024:      # v5e / v6e
        scoped_vmem = 48 * 1024 * 1024
        tile_candidates = (1024, 768, 512, 384, 256, 128)
    else:                                                # v7x (64 MiB) / unknown
        scoped_vmem = 32 * 1024 * 1024
        tile_candidates = (512, 384, 256, 128)
    # Each in/out block is double-buffered: peak ~= 4 * block_bytes.
    block_budget = (scoped_vmem * 3) // 4

    aligned = (H % 128 == 0) and (W % 128 == 0)
    slab_bytes = H * W * itemsize            # one (n, c) spatial slab

    if not aligned and 4 * slab_bytes <= block_budget:
        # ---- Path B: small / unaligned spatial dims ------------------------
        # Full-extent (H, W) blocks (always legal); fold as many channels as
        # the VMEM budget allows so each grid step moves one big DMA.
        cb = _largest_divisor_leq(C, max(1, block_budget // (4 * slab_bytes)))
        # Keep >= 2 grid steps so both v7x TensorCores get work.
        if N * (C // cb) < 2 and C > 1:
            cb = _largest_divisor_leq(C, C // 2)
        grid = (N, C // cb)
        return pl.pallas_call(
            _relu_transpose_kernel,
            out_shape=jax.ShapeDtypeStruct((N, C, W, H), x.dtype),
            grid=grid,
            in_specs=[pl.BlockSpec((1, cb, H, W), lambda n, c: (n, c, 0, 0))],
            out_specs=pl.BlockSpec((1, cb, W, H), lambda n, c: (n, c, 0, 0)),
            compiler_params=pltpu.CompilerParams(
                dimension_semantics=("parallel", "parallel"),
                vmem_limit_bytes=scoped_vmem,
            ),
        )(x)

    # ---- Path A/C: tiled, lane-dense path ---------------------------------
    # Pad H / W up to 128-multiples if needed (ReLU(0) = 0; padding is sliced
    # off below) so every load and every transposed store is an unmasked,
    # lane-dense DMA and no tile can exceed the VMEM budget.
    Hp = ((H + 127) // 128) * 128
    Wp = ((W + 127) // 128) * 128
    xp = x
    if (Hp, Wp) != (H, W):
        xp = jnp.pad(x, ((0, 0), (0, 0), (0, Hp - H), (0, Wp - W)))

    tH = _pick_tile(Hp, tile_candidates)
    tW = _pick_tile(Wp, tile_candidates)
    tile_bytes = tH * tW * itemsize
    cb = _largest_divisor_leq(C, max(1, block_budget // (4 * tile_bytes)))
    if N * (C // cb) * (Hp // tH) * (Wp // tW) < 2 and C > 1:
        cb = _largest_divisor_leq(C, C // 2)

    # Grid order: H-tile index innermost so the *output* writeback advances
    # its minor block index fastest (sequential HBM writes, strided reads).
    grid = (N, C // cb, Wp // tW, Hp // tH)
    out_p = pl.pallas_call(
        _relu_transpose_kernel,
        out_shape=jax.ShapeDtypeStruct((N, C, Wp, Hp), x.dtype),
        grid=grid,
        in_specs=[pl.BlockSpec((1, cb, tH, tW), lambda n, c, j, i: (n, c, i, j))],
        out_specs=pl.BlockSpec((1, cb, tW, tH), lambda n, c, j, i: (n, c, j, i)),
        compiler_params=pltpu.CompilerParams(
            dimension_semantics=("parallel", "parallel", "parallel", "parallel"),
            vmem_limit_bytes=scoped_vmem,
        ),
    )(xp)
    if (Hp, Wp) != (H, W):
        out_p = out_p[:, :, :W, :H]
    return out_p


if __name__ == "__main__":
    # Small 4-D input consistent with permute(0, 1, 3, 2): (batch, channels, H, W).
    key = jax.random.PRNGKey(0)
    x = jax.random.normal(key, (2, 4, 16, 16), dtype=jnp.float32)

    y = jax.block_until_ready(relu_permute_0132(x))

    # Reference check (pure JAX).
    ref = jnp.transpose(jnp.maximum(x, 0.0), (0, 1, 3, 2))
    assert y.shape == (2, 4, 16, 16), y.shape
    assert jnp.allclose(y, ref), "mismatch vs. reference relu+permute"

    print("KERNEL_OK")
</pallas_src>

<mosaic_0001>
module attributes {stable_mosaic.version = 11 : i64} {
  func.func @_relu_transpose_kernel(%arg0: i32, %arg1: i32, %arg2: memref<1x4x16x16xf32, #tpu.memory_space<vmem>>, %arg3: memref<1x4x16x16xf32, #tpu.memory_space<vmem>>) attributes {dimension_semantics = [#tpu.dimension_semantics<parallel>, #tpu.dimension_semantics<parallel>], iteration_bounds = array<i64: 2, 1>, scalar_prefetch = 0 : i64, scratch_operands = 0 : i64, tpu.core_type = #tpu.core_type<tc>, window_params = [{transform_indices = @transform_0, window_bounds = array<i64: 1, 4, 16, 16>}, {transform_indices = @transform_1, window_bounds = array<i64: 1, 4, 16, 16>}]} {
    %c0 = arith.constant 0 : index
    %c0_0 = arith.constant 0 : index
    %c0_1 = arith.constant 0 : index
    %c0_2 = arith.constant 0 : index
    %0 = vector.load %arg2[%c0, %c0_0, %c0_1, %c0_2] : memref<1x4x16x16xf32, #tpu.memory_space<vmem>>, vector<1x4x16x16xf32>
    %cst = arith.constant 0.000000e+00 : f32
    %1 = vector.broadcast %cst : f32 to vector<1x4x16x16xf32>
    %2 = arith.maximumf %0, %1 : vector<1x4x16x16xf32>
    %3 = tpu.transpose %2, [0, 1, 3, 2] : vector<1x4x16x16xf32> -> vector<1x4x16x16xf32>
    %c0_3 = arith.constant 0 : index
    %c0_4 = arith.constant 0 : index
    %c0_5 = arith.constant 0 : index
    %c0_6 = arith.constant 0 : index
    %4 = vector.load %arg3[%c0_3, %c0_4, %c0_5, %c0_6] : memref<1x4x16x16xf32, #tpu.memory_space<vmem>>, vector<1x4x16x16xf32>
    tpu.vector_store %arg3[%c0_3, %c0_4, %c0_5, %c0_6], %3 {strides = array<i32>} : memref<1x4x16x16xf32, #tpu.memory_space<vmem>>, vector<1x4x16x16xf32>,
    return
  }
  func.func @transform_0(%arg0: i32, %arg1: i32) -> (i32, i32, i32, i32) {
    %c0_i32 = arith.constant 0 : i32
    %c0_i32_0 = arith.constant 0 : i32
    %c0_i32_1 = arith.constant 0 : i32
    return %arg0, %arg1, %c0_i32, %c0_i32_0 : i32, i32, i32, i32
  }
  func.func @transform_1(%arg0: i32, %arg1: i32) -> (i32, i32, i32, i32) {
    %c0_i32 = arith.constant 0 : i32
    %c0_i32_0 = arith.constant 0 : i32
    %c0_i32_1 = arith.constant 0 : i32
    return %arg0, %arg1, %c0_i32, %c0_i32_0 : i32, i32, i32, i32
  }
}

</mosaic_0001>

<bundles_post_ra>
// kernel: tpu_custom_call.1
= control target key start
LH: loop header
LB: loop body
LE: loop exit
PB: predicated region body
PF: predicated region fallthrough
CT: control target
= control target key end

     0   :  { %6 = vsyncpa [#allocation3], 0  ;;  %s781_s0 = inlined_call_operand.hbm [shape: f32[2,4,16,16], index: 0, kind: input, shape index: {}]   ;;  %s782_s1 = inlined_call_operand.hbm [shape: f32[2,4,16,16], index: 1, kind: output, shape index: {}]  }
   0x1   :  { %8 = vsyncpa [#allocation3 + $0x1], 0 }
   0x2   :  { %9 = vsyncpa [#allocation4], 0 }
   0x3   :  { %11 = vsyncpa [#allocation4 + $0x1], 0  ;;  %s623_s6 = smov 0   ;;  %s625_s7 = smov 0  }
   0x4   :  { %s627_s8 = smov 0   ;;  %s629_s9 = smov 0  }
   0x5   :  { %s631_s10 = smov 0   ;;  %s633_s11 = smov 0  }
   0x6 LB: > { %s413_s12 = sadd.s32 4294967295, %s605_s11   ;;  %s414_s13 = sadd.s32 4294967294, %s605_s11   ;;  %s605_s11 = sphi %s633_s11, %s17_s11   ;;  %s601_s10 = sphi %s631_s10, %s793_s10   ;;  %s597_s9 = sphi %s629_s9, %s792_s9   ;;  %s593_s8 = sphi %s627_s8, %s791_s8   ;;  %s589_s7 = sphi %s625_s7, %s790_s7   ;;  %s585_s6 = sphi %s623_s6, %s789_s6  }
   0x7   : > { %s29_s14 = sadd.s32 1, %s601_s10  ;;  %s38_s15 = sadd.s32 1, %s593_s8 }
   0x8   : > { %p31_p0 = scmp.ge.s32.totalorder %s29_s14, 2  ;;  %p45_p1 = scmp.ne.s32.totalorder %s593_s8, %s589_s7 }
   0x9   : > { %p46_p2 = scmp.eq.s32.totalorder %s605_s11, 0  ;;  %p51_p3 = scmp.ne.s32.totalorder %s589_s7, %s585_s6 }
   0xa   : > { %s795_s14 = smov (%p31_p0, %s29_s14), 0  ;;  %p52_p5 = scmp.eq.s32.totalorder %s413_s12, 0 }
   0xb   : > { %p664_p4 = por %p46_p2, %p45_p1  ;;  %s33_s17 = ssub.s32 %s601_s10, %s795_s14 }
   0xc   : > { %p77_p6 = scmp.eq.s32.totalorder %s413_s12, 1  ;;  %p36_p7 = scmp.eq.s32.totalorder %s33_s17, 0 }
   0xd   : > { %p670_p8 = por %p52_p5, %p51_p3  ;;  %p83_p10 = scmp.eq.s32.totalorder %s414_s13, 1 }
   0xe   : > { %p674_p9 = por %p77_p6, %p45_p1  ;;  %p442_p13 = scmp.lt.s32.totalorder %s605_s11, 2 }
   0xf   : > { %s679_s20 = scalar_select %p36_p7, %s593_s8, %s38_s15  }
  0x10   : > { %p681_p11 = por %p83_p10, %p51_p3  ;;  %s103_s22 = sand.u32 1, %s593_s8  }
  0x11   : > { %s417_s23 = sshll.u32 %s103_s22, 6  ;;  %s428_s24 = sshll.u32 %s601_s10, 10 }
  0x12   : > { %s116_s27 = scalar_lea.hbm %s781_s0, %s428_s24  ;;  %s107_s28 = scalar_lea.vmem [#allocation2], %s417_s23 }
  0x13   : > { %s117_s29 = sshll.u32 %s107_s28, 4  ;;  %p694_p0 = pnand %p442_p13, %p664_p4  ;;  %s118_s29 = int_to_ptr.vmem [resolvable:$true] %s117_s29 }
  0x14   : > { %p420_p1 = scmp.ge.s32.totalorder %s605_s11, 1  ;;  %s104_s2 = scalar_lea.sflag [#allocation3], %s103_s22 }
  0x15   : > { %p499_p2 = pneg %p694_p0  ;;  %s510_s3 = scalar_lea.vmem %s118_s29, 1024 }
  0x16   : > { %p511_p3 = scmp.ne.s32.totalorder %s118_s29, %s510_s3  ;;  %s607_s4 = smov [#allocation2]  }
  0x17   : > { %s515_s5 = sshll.u32 %s607_s4, 4  ;;  %s516_s5 = int_to_ptr.vmem [resolvable:$false] %s515_s5 }
  0x18   : > { %p513_p5 = pnand %p511_p3, %p499_p2  ;;  %s517_s12 = scalar_lea.vmem %s516_s5, 2048 }
  0x19   : > { %p518_p7 = scmp.lt.s32.totalorder %s118_s29, %s516_s5  ;;  %p519_p10 = scmp.lt.s32.totalorder %s517_s12, %s510_s3 }
  0x1a   : > { %p514_p6 = pneg %p513_p5 }
  0x1b   : > { %p520_p12 = por %p519_p10, %p518_p7 }
  0x1d   : > { %p521_p4 = pnand %p520_p12, %p514_p6 }
  0x1f   : > { %524 = shalt.err (!%p521_p4)
}
  0x20   : > { %s608_s13 = smov 128   ;;  %s609_s15 = smov 8  }
  0x21   : > { %437 = dma.hbm_to_vmem [thread:$0]  (!%p694_p0), %s116_s27, 1024, %s118_s29, %s104_s2, %s608_s13, %s608_s13, %s609_s15  }
  0x22   : > { %p125_p13 = scmp.lt.s32.totalorder %s605_s11, 3 }
  0x24   : > { %p126_p2 = pnand %p420_p1, %p125_p13 }
  0x25   : > { %s707_s16 = sand.u32 (!%p126_p2), 1, %s589_s7  }
  0x26   : > { %129 = sbr.rel (%p126_p2) target bundleno = 198 (0xc6), region = 24  ;;  %s421_s17 = sshll.u32 (!%p126_p2), %s707_s16, 6 }
  0x27   : > { %s132_s22 = scalar_lea.sflag (!%p126_p2), [#allocation3], %s707_s16  ;;  %s135_s23 = scalar_lea.vmem (!%p126_p2), [#allocation2], %s421_s17 }
  0x2b   : > { %576 = dma.done.wait (%p670_p8), %s132_s22, 1024  }
  0x2c   : > { %578 = vsyncadd (%p670_p8), %s132_s22, 4294966272  ;;  %v158_v0 = vld [vmem:[%s135_s23 + $0x10] sm:$0xff]  ;;  %v156_v1 = vld [vmem:[%s135_s23] sm:$0xff]  ;;  %vm300_vm0 = vcmask 130048   ;;  %s153_s18 = scalar_lea.vmem [#allocation5], %s421_s17  ;;  %s429_s25 = sshll.u32 %s597_s9, 10 }
  0x2d   : > { %v159_v2 = vld [vmem:[%s135_s23 + $0x18] sm:$0xff]  ;;  %v166_v3 = vmax.f32 %v158_v0, 0.0  ;;  %v164_v4 = vmax.f32 %v156_v1, 0.0  ;;  %v157_v5 = vld [vmem:[%s135_s23 + $0x8] sm:$0xff]  ;;  %v162_v8 = vld [vmem:[%s135_s23 + $0x30] sm:$0xff]  ;;  %s326_s24 = sshll.u32 %s153_s18, 4  ;;  %s731_s28 = scalar_lea.hbm %s782_s1, %s429_s25  ;;  %s724_s24 = int_to_ptr.vmem [resolvable:$true] %s326_s24 }
  0x2e   : > { %v167_v6 = vmax.f32 %v159_v2, 0.0  ;;  %v165_v7 = vmax.f32 %v157_v5, 0.0  ;;  %v160_v9 = vld [vmem:[%s135_s23 + $0x20] sm:$0xff]  ;;  %v170_v10 = vmax.f32 %v162_v8, 0.0  ;;  %v163_v12 = vld [vmem:[%s135_s23 + $0x38] sm:$0xff]  ;;  %v161_v13 = vld [vmem:[%s135_s23 + $0x28] sm:$0xff] }
  0x2f   : > { %204 = vxpose.xlu1.b32.start [1/2] (short) (narrow) %v166_v3, 16  ;;  %172 = vxpose.xlu0.b32.start [1/2] (short) (narrow) %v164_v4, 16  ;;  %v168_v11 = vmax.f32 %v160_v9, 0.0  ;;  %v171_v14 = vmax.f32 %v163_v12, 0.0  ;;  %v169_v15 = vmax.f32 %v161_v13, 0.0  ;;  %s310_s9 = scalar_lea.sflag [#allocation4], %s707_s16 }
  0x30   : > { %s525_s29 = scalar_lea.vmem %s724_s24, 1024  ;;  %s610_s30 = smov [#allocation5]  }
  0x31   : > { %p526_p8 = scmp.ne.s32.totalorder %s724_s24, %s525_s29  ;;  %s529_s2 = sshll.u32 %s610_s30, 4  ;;  %s530_s2 = int_to_ptr.vmem [resolvable:$false] %s529_s2 }
  0x32   : > { %s531_s3 = scalar_lea.vmem %s530_s2, 2048  ;;  %p532_p1 = scmp.lt.s32.totalorder %s724_s24, %s530_s2 }
  0x33   : > { %205 = vxpose.xlu1.b32.end [2/2] (short) (narrow) %v167_v6, 16  ;;  %173 = vxpose.xlu0.b32.end [2/2] (short) (narrow) %v165_v7, 16  ;;  %p527_p12 = pnand %p526_p8, %p674_p9  ;;  %p533_p3 = scmp.lt.s32.totalorder %s531_s3, %s525_s29 }
  0x35   : > { %p528_p0 = pneg %p527_p12  ;;  %p534_p5 = por %p533_p3, %p532_p1 }
  0x37   : > { %268 = vxpose.xlu1.b32.start [1/2] (short) (narrow) %v170_v10, 16  ;;  %236 = vxpose.xlu0.b32.start [1/2] (short) (narrow) %v168_v11, 16  ;;  %p535_p6 = pnand %p534_p5, %p528_p0 }
  0x3b   : > { %269 = vxpose.xlu1.b32.end [2/2] (short) (narrow) %v171_v14, 16  ;;  %237 = vxpose.xlu0.b32.end [2/2] (short) (narrow) %v169_v15, 16 }
  0xab   : > { %v220_v16 = vpop.trf.xlu1  ;;  %v188_v17 = vpop.trf.xlu0 }
  0xac   : > { %303 = vst.msk [vmem:[%s153_s18 + $0x10] sm:$0xff] %vm300_vm0, %v220_v16  ;;  %301 = vst.msk [vmem:[%s153_s18] sm:$0xff] %vm300_vm0, %v188_v17 }
  0xaf   : > { %v221_v18 = vpop.trf.xlu1  ;;  %v189_v19 = vpop.trf.xlu0 }
  0xb0   : > { %304 = vst.msk [vmem:[%s153_s18 + $0x18] sm:$0xff] %vm300_vm0, %v221_v18  ;;  %302 = vst.msk [vmem:[%s153_s18 + $0x8] sm:$0xff] %vm300_vm0, %v189_v19 }
  0xb3   : > { %v284_v20 = vpop.trf.xlu1  ;;  %v252_v21 = vpop.trf.xlu0 }
  0xb4   : > { %307 = vst.msk [vmem:[%s153_s18 + $0x30] sm:$0xff] %vm300_vm0, %v284_v20  ;;  %305 = vst.msk [vmem:[%s153_s18 + $0x20] sm:$0xff] %vm300_vm0, %v252_v21 }
  0xb7   : > { %v285_v22 = vpop.trf.xlu1  ;;  %v253_v23 = vpop.trf.xlu0 }
  0xb8   : > { %308 = vst.msk [vmem:[%s153_s18 + $0x38] sm:$0xff] %vm300_vm0, %v285_v22  ;;  %306 = vst.msk [vmem:[%s153_s18 + $0x28] sm:$0xff] %vm300_vm0, %v253_v23 }
  0xb9   : > { %538 = shalt.err (!%p535_p6)
}
  0xba   : > { %s539_s4 = scalar_lea.hbm %s731_s28, 1024  ;;  %s543_s13 = scalar_lea.hbm %s782_s1, 2048 }
  0xbb   : > { %p540_p7 = scmp.ne.s32.totalorder %s731_s28, %s539_s4  ;;  %p544_p13 = scmp.lt.s32.totalorder %s731_s28, %s782_s1 }
  0xbc   : > { %p545_p2 = scmp.lt.s32.totalorder %s543_s13, %s539_s4 }
  0xbd   : > { %p541_p10 = pnand %p540_p7, %p674_p9 }
  0xbe   : > { %p546_p8 = por %p545_p2, %p544_p13 }
  0xbf   : > { %p542_p4 = pneg %p541_p10 }
  0xc1   : > { %p547_p12 = pnand %p546_p8, %p542_p4 }
  0xc3   : > { %550 = shalt.err (!%p547_p12)
}
  0xc4   : > { %s611_s22 = smov 128   ;;  %s612_s23 = smov 8  }
  0xc5   : > { %432 = dma.vmem_to_hbm [thread:$0]  (%p674_p9), %s724_s24, 1024, %s731_s28, %s310_s9, %s611_s22, %s611_s22, %s612_s23  }
  0xc6 PF: > { %s341_s18 = sand.u32 1, %s585_s6   ;;  %p788_p0 = scmp.ge.s32.totalorder %s605_s11, 2 }
  0xc7   : > { %s342_s25 = scalar_lea.sflag [#allocation4], %s341_s18 }
  0xc8   : > { %p439_p1 = pnand %p788_p0, %p681_p11 }
  0xca   : > { %p440_p3 = pneg %p439_p1 }
  0xcc   : > { %580 = dma.done.wait (%p440_p3), %s342_s25, 1024  }
  0xcd   : > { %582 = vsyncadd (%p440_p3), %s342_s25, 4294966272  ;;  %s17_s11 = sadd.s32 1, %s605_s11   ;;  %s789_s6 = smov %s589_s7 }
  0xce   : > { %p14_p5 = scmp.ge.s32.totalorder %s17_s11, 4   ;;  %s790_s7 = smov %s593_s8 }
  0xcf   : > { %s791_s8 = smov %s679_s20  ;;  %s792_s9 = smov %s601_s10 }
  0xd0   : > { %s793_s10 = smov %s795_s14  ;;  %16 = sbr.rel (!%p14_p5) target bundleno = 6 (0x6), region = 69 }
  0xd5   :  { %347 = vsyncpa [#allocation3], 1 }
  0xd6   :  { %349 = vsyncpa [#allocation3 + $0x1], 1 }
  0xd7   :  { %350 = vsyncpa [#allocation4], 1 }
  0xd8   :  { %352 = vsyncpa [#allocation4 + $0x1], 1 }

</bundles_post_ra>
